<compile_context>
chip_gen: v5e
topology: v5e:2x2
jax: 0.10.0
libtpu: 0.0.40
codegen_flags: <defaults>
</compile_context>

<pallas_src>
import functools

import jax
import jax.numpy as jnp
from jax.experimental import pallas as pl
from jax.experimental.pallas import tpu as pltpu


# ---------------------------------------------------------------------------
# Pallas kernel: per-tile partial sums
# ---------------------------------------------------------------------------
def _masked_loss_kernel(
    masked_logits_ref,      # (TB, C)
    unmasked_logits_ref,    # (TB, C)
    targets_ref,            # (TB, 1) int32
    unmasked_feat_ref,      # (TB, F)
    masked_feat_ref,        # (TB, F)
    soft_mask_ref,          # (TB, M)
    radial_mask_ref,        # (TB, M)
    sums_ref,               # (1, 8, 128) f32: 8 partial sums, lane-broadcast
    *,
    batch_size: int,
    tile_rows: int,
    upper_mask_level_threshold: float,
    compute_entropy: bool,
):
    i = pl.program_id(0)
    # Valid-row mask: rows >= batch_size are zero-padding added in the wrapper.
    row = i * tile_rows + jax.lax.broadcasted_iota(jnp.int32, (tile_rows, 1), 0)
    valid = (row < batch_size).astype(jnp.float32)               # (TB, 1)

    tgt = targets_ref[...]                                       # (TB, 1) i32

    # ----- cross entropy (sum of per-sample CE over valid rows) --------------
    def ce_sum(logits_raw):
        logits = logits_raw.astype(jnp.float32)
        m = jnp.max(logits, axis=-1, keepdims=True)
        z = logits - m
        lse = jnp.log(jnp.sum(jnp.exp(z), axis=-1, keepdims=True))
        logp = z - lse                                           # (TB, C)
        cls = jax.lax.broadcasted_iota(jnp.int32, logits.shape, 1)
        onehot = (cls == tgt).astype(jnp.float32)
        per_sample = -jnp.sum(onehot * logp, axis=-1, keepdims=True)  # (TB, 1)
        return jnp.sum(per_sample * valid)

    ce_masked_sum = ce_sum(masked_logits_ref[...])
    ce_unmasked_sum = ce_sum(unmasked_logits_ref[...])

    # ----- alignment: cosine similarity of L2-normalized features ------------
    norm_eps = 1e-12

    def l2_normalize(x_raw):
        x = x_raw.astype(jnp.float32)
        nrm = jnp.sqrt(jnp.sum(x * x, axis=-1, keepdims=True))
        return x / jnp.maximum(nrm, norm_eps)

    u_n = l2_normalize(unmasked_feat_ref[...])
    m_n = l2_normalize(masked_feat_ref[...])   # .detach() is a forward no-op
    cos = jnp.sum(u_n * m_n, axis=-1, keepdims=True)             # (TB, 1)
    cos_sum = jnp.sum(cos * valid)

    # ----- mask statistics (padded rows are zero -> contribute 0 to sums) ----
    s = soft_mask_ref[...].astype(jnp.float32)                   # (TB, M)
    r = radial_mask_ref[...].astype(jnp.float32)                 # (TB, M)

    soft_sum = jnp.sum(s)
    radial_sum = jnp.sum(r)
    bern_sum = jnp.sum(r * (1.0 - r))
    fully_sum = jnp.sum(
        (r > upper_mask_level_threshold).astype(jnp.float32) * valid)

    if compute_entropy:
        eps = 1e-6
        ent = -(s * jnp.log(s + eps) + (1.0 - s) * jnp.log(1.0 - s + eps))
        ent_sum = jnp.sum(ent * valid)
    else:
        ent_sum = jnp.float32(0.0)

    # ----- pack the 8 partial sums into one lane-dense (1, 8, 128) block -----
    vals = (ce_masked_sum, ce_unmasked_sum, cos_sum, soft_sum, radial_sum,
            bern_sum, ent_sum, fully_sum)
    sub = jax.lax.broadcasted_iota(jnp.int32, (1, 8, 128), 1)
    packed = jnp.zeros((1, 8, 128), jnp.float32)
    for k, v in enumerate(vals):
        packed = packed + jnp.where(sub == k, v, 0.0)
    sums_ref[...] = packed


# ---------------------------------------------------------------------------
# pallas_call wrapper
# ---------------------------------------------------------------------------
def _round_up(x, m):
    return ((x + m - 1) // m) * m


def _choose_tile_rows(b, bytes_per_row):
    # Per-buffer budget of ~6 MiB; with double-buffering (x2) the inputs stay
    # well under the 16 MiB v5e scoped-VMEM default (and v6e/v7x defaults).
    budget = 6 * 1024 * 1024
    tb = max(8, min(512, (budget // max(bytes_per_row, 1)) // 8 * 8))
    tb = min(tb, _round_up(b, 8))
    return tb


def _run_reductions(masked_logits, unmasked_logits, targets_2d,
                    unmasked_feat, masked_feat, soft_mask_2d, radial_mask_2d,
                    upper_mask_level_threshold, compute_entropy):
    b, c = masked_logits.shape
    f = unmasked_feat.shape[1]
    m = soft_mask_2d.shape[1]

    bytes_per_row = (
        c * (masked_logits.dtype.itemsize + unmasked_logits.dtype.itemsize)
        + f * (unmasked_feat.dtype.itemsize + masked_feat.dtype.itemsize)
        + m * (soft_mask_2d.dtype.itemsize + radial_mask_2d.dtype.itemsize)
        + targets_2d.dtype.itemsize)
    tb = _choose_tile_rows(b, bytes_per_row)
    b_pad = _round_up(b, tb)
    num_tiles = b_pad // tb

    def pad_rows(x):
        if b_pad == b:
            return x
        return jnp.pad(x, ((0, b_pad - b),) + ((0, 0),) * (x.ndim - 1))

    args = [pad_rows(a) for a in (masked_logits, unmasked_logits, targets_2d,
                                  unmasked_feat, masked_feat,
                                  soft_mask_2d, radial_mask_2d)]

    kernel = functools.partial(
        _masked_loss_kernel,
        batch_size=b,
        tile_rows=tb,
        upper_mask_level_threshold=float(upper_mask_level_threshold),
        compute_entropy=compute_entropy)

    def row_spec(cols):
        return pl.BlockSpec((tb, cols), lambda i: (i, 0))

    bytes_accessed = (sum(int(a.size) * a.dtype.itemsize for a in args)
                      + num_tiles * 8 * 128 * 4)
    transcendentals = 2 * b * c + (2 * b * m if compute_entropy else 0)
    flops = 8 * b * (c + f + m)

    partials = pl.pallas_call(
        kernel,
        grid=(num_tiles,),
        in_specs=[
            row_spec(c), row_spec(c), row_spec(1),
            row_spec(f), row_spec(f),
            row_spec(m), row_spec(m),
        ],
        out_specs=pl.BlockSpec((1, 8, 128), lambda i: (i, 0, 0)),
        out_shape=jax.ShapeDtypeStruct((num_tiles, 8, 128), jnp.float32),
        compiler_params=pltpu.CompilerParams(
            dimension_semantics=("parallel",),
            vmem_limit_bytes=32 * 1024 * 1024),
        cost_estimate=pl.CostEstimate(
            flops=int(flops),
            transcendentals=int(transcendentals),
            bytes_accessed=int(bytes_accessed)),
    )(*args)

    # Final cross-tile reduce in glue (f32 sums).
    return jnp.sum(partials[:, :, 0], axis=0)   # (8,)


# ---------------------------------------------------------------------------
# Module-equivalent wrapper
# ---------------------------------------------------------------------------
def masked_loss_forward(
    outputs,
    targets,
    *,
    lambda_mask=1.0,
    lambda_fully_masked=0.05,
    dynamic_masked_weight_min=1.0,
    dynamic_masked_weight_max=5.0,
    lambda_alignment=0.5,
    upper_mask_level_threshold=0.8,
    lambda_entropy=0.0,
):
    # targets normalization (matches the PyTorch squeeze/unsqueeze logic)
    targets = jnp.asarray(targets)
    if targets.ndim == 2 and targets.shape[1] == 1:
        targets = jnp.squeeze(targets, axis=1)
    elif targets.ndim == 0:
        targets = targets[None]
    targets = targets.astype(jnp.int32)
    # TODO(synk): the empty-targets early-return branch is a dynamic-shape
    # guard; with static JAX shapes it is unreachable and is not implemented.

    masked_logits = outputs['masked_logits']
    unmasked_logits = outputs['unmasked_logits']
    unmasked_feat = outputs['unmasked_mlp_features']
    masked_feat = outputs['masked_mlp_features']

    b = masked_logits.shape[0]
    # Native storage dtype is kept; casts to f32 happen inside the kernel.
    soft_mask_2d = outputs['soft_mask'].reshape(b, -1)
    radial_mask_2d = outputs['radial_mask'].reshape(b, -1)
    targets_2d = targets.reshape(b, 1)

    m_elems = soft_mask_2d.shape[1]
    compute_entropy = (float(lambda_entropy) != 0.0)

    totals = _run_reductions(
        masked_logits, unmasked_logits, targets_2d,
        unmasked_feat, masked_feat, soft_mask_2d, radial_mask_2d,
        upper_mask_level_threshold, compute_entropy)

    inv_b = 1.0 / b
    inv_mask = 1.0 / (b * m_elems)

    masked_loss_mean = totals[0] * inv_b
    unmasked_loss_mean = totals[1] * inv_b
    cos_sim_mean = totals[2] * inv_b
    mask_mean = totals[3] * inv_mask
    radial_mean = totals[4] * inv_mask
    radial_bern_mean = totals[5] * inv_mask
    entropy_mean = totals[6] * inv_mask
    fully_masked_frac = totals[7] * inv_mask

    # scalar glue (matches the PyTorch arithmetic exactly)
    loss_gap = jnp.maximum(masked_loss_mean - unmasked_loss_mean, 0.0)
    dynamic_weight = jnp.minimum(
        jnp.maximum(1.0 + loss_gap, dynamic_masked_weight_min),
        dynamic_masked_weight_max)
    weighted_masked_loss = dynamic_weight * masked_loss_mean
    classification_loss = weighted_masked_loss + unmasked_loss_mean

    masking_loss = lambda_mask * (1.0 - mask_mean) ** 2
    binary_loss = lambda_fully_masked * radial_bern_mean

    alignment_divergence = 1.0 - cos_sim_mean
    alignment_loss = lambda_alignment * alignment_divergence

    entropy_loss = lambda_entropy * entropy_mean

    total_loss = (classification_loss + masking_loss + binary_loss
                  + alignment_loss + entropy_loss)

    fully_masked_pct = 100.0 * fully_masked_frac

    return {
        'total_loss': total_loss,
        'classification_loss': classification_loss,
        'masked_loss': masked_loss_mean,
        'unmasked_loss': unmasked_loss_mean,
        'masking_loss': masking_loss,
        'fully_masked_loss': binary_loss,
        'alignment_loss': alignment_loss,
        'alignment_divergence': alignment_divergence,
        'mask_mean': mask_mean,
        'binary_mask_mean': radial_mean,
        'fully_masked_pct': fully_masked_pct,
        'dynamic_weight': dynamic_weight,
        'entropy_loss': entropy_loss,
    }


# ---------------------------------------------------------------------------
# Demo / smoke test
# ---------------------------------------------------------------------------
if __name__ == "__main__":
    key = jax.random.PRNGKey(0)
    B, C, F, H, W = 8, 16, 32, 16, 16

    ks = jax.random.split(key, 8)
    outputs = {
        'soft_mask': jax.nn.sigmoid(jax.random.normal(ks[0], (B, 1, H, W), jnp.float32)),
        'radial_mask': jax.nn.sigmoid(jax.random.normal(ks[1], (B, 1, H, W), jnp.float32)),
        'binary_mask': (jax.random.uniform(ks[2], (B, 1, H, W)) > 0.5).astype(jnp.float32),
        'mask': jax.nn.sigmoid(jax.random.normal(ks[3], (B, 1, H, W), jnp.float32)),
        'masked_logits': jax.random.normal(ks[4], (B, C), jnp.float32),
        'unmasked_logits': jax.random.normal(ks[5], (B, C), jnp.float32),
        'unmasked_mlp_features': jax.random.normal(ks[6], (B, F), jnp.float32),
        'masked_mlp_features': jax.random.normal(ks[7], (B, F), jnp.float32),
    }
    targets = jax.random.randint(jax.random.PRNGKey(1), (B, 1), 0, C, dtype=jnp.int32)

    # Exercise both the entropy-enabled and entropy-elided (static) paths.
    result = masked_loss_forward(outputs, targets, lambda_entropy=0.1)
    result = jax.tree_util.tree_map(jax.block_until_ready, result)
    result_noent = masked_loss_forward(outputs, targets, lambda_entropy=0.0)
    result_noent = jax.tree_util.tree_map(jax.block_until_ready, result_noent)

    assert bool(jnp.isfinite(result['total_loss']))
    assert bool(jnp.isfinite(result_noent['total_loss']))
    print("KERNEL_OK")
</pallas_src>

<mosaic_0001>
module attributes {stable_mosaic.version = 11 : i64} {
  func.func @_masked_loss_kernel(%arg0: i32, %arg1: memref<8x16xf32, #tpu.memory_space<vmem>>, %arg2: memref<8x16xf32, #tpu.memory_space<vmem>>, %arg3: memref<8x1xi32, #tpu.memory_space<vmem>>, %arg4: memref<8x32xf32, #tpu.memory_space<vmem>>, %arg5: memref<8x32xf32, #tpu.memory_space<vmem>>, %arg6: memref<8x256xf32, #tpu.memory_space<vmem>>, %arg7: memref<8x256xf32, #tpu.memory_space<vmem>>, %arg8: memref<1x8x128xf32, #tpu.memory_space<vmem>>) attributes {dimension_semantics = [#tpu.dimension_semantics<parallel>], iteration_bounds = array<i64: 1>, scalar_prefetch = 0 : i64, scratch_operands = 0 : i64, tpu.core_type = #tpu.core_type<tc>, window_params = [{transform_indices = @transform_0, window_bounds = array<i64: 8, 16>}, {transform_indices = @transform_1, window_bounds = array<i64: 8, 16>}, {transform_indices = @transform_2, window_bounds = array<i64: 8, 1>}, {transform_indices = @transform_3, window_bounds = array<i64: 8, 32>}, {transform_indices = @transform_4, window_bounds = array<i64: 8, 32>}, {transform_indices = @transform_5, window_bounds = array<i64: 8, 256>}, {transform_indices = @transform_6, window_bounds = array<i64: 8, 256>}, {transform_indices = @transform_7, window_bounds = array<i64: 1, 8, 128>}]} {
    %c8_i32 = arith.constant 8 : i32
    %0 = arith.muli %arg0, %c8_i32 : i32
    %1 = tpu.iota {dimensions = array<i32: 0>} : vector<8x1xi32>
    %2 = vector.broadcast %0 : i32 to vector<8x1xi32>
    %3 = arith.addi %2, %1 : vector<8x1xi32>
    %c8_i32_0 = arith.constant 8 : i32
    %4 = vector.broadcast %c8_i32_0 : i32 to vector<8x1xi32>
    %5 = arith.cmpi slt, %3, %4 : vector<8x1xi32>
    %6 = arith.extui %5 : vector<8x1xi1> to vector<8x1xi32>
    %7 = arith.sitofp %6 : vector<8x1xi32> to vector<8x1xf32>
    %c0 = arith.constant 0 : index
    %c0_1 = arith.constant 0 : index
    %8 = vector.load %arg3[%c0, %c0_1] : memref<8x1xi32, #tpu.memory_space<vmem>>, vector<8x1xi32>
    %c0_2 = arith.constant 0 : index
    %c0_3 = arith.constant 0 : index
    %9 = vector.load %arg1[%c0_2, %c0_3] : memref<8x16xf32, #tpu.memory_space<vmem>>, vector<8x16xf32>
    %cst = arith.constant dense<0xFF800000> : vector<8xf32>
    %10 = vector.multi_reduction <maximumf>, %9, %cst [1] : vector<8x16xf32> to vector<8xf32>
    %11 = vector.shape_cast %10 : vector<8xf32> to vector<8x1xf32>
    %12 = vector.broadcast %11 : vector<8x1xf32> to vector<8x16xf32>
    %13 = arith.subf %9, %12 : vector<8x16xf32>
    %14 = math.exp %13 : vector<8x16xf32>
    %cst_4 = arith.constant dense<0.000000e+00> : vector<8xf32>
    %15 = vector.multi_reduction <add>, %14, %cst_4 [1] : vector<8x16xf32> to vector<8xf32>
    %16 = vector.shape_cast %15 : vector<8xf32> to vector<8x1xf32>
    %17 = math.log %16 : vector<8x1xf32>
    %18 = vector.broadcast %17 : vector<8x1xf32> to vector<8x16xf32>
    %19 = arith.subf %13, %18 : vector<8x16xf32>
    %20 = tpu.iota {dimensions = array<i32: 1>} : vector<8x16xi32>
    %21 = vector.broadcast %8 : vector<8x1xi32> to vector<8x16xi32>
    %22 = arith.cmpi eq, %20, %21 : vector<8x16xi32>
    %23 = arith.extui %22 : vector<8x16xi1> to vector<8x16xi32>
    %24 = arith.sitofp %23 : vector<8x16xi32> to vector<8x16xf32>
    %25 = arith.mulf %24, %19 : vector<8x16xf32>
    %cst_5 = arith.constant dense<0.000000e+00> : vector<8xf32>
    %26 = vector.multi_reduction <add>, %25, %cst_5 [1] : vector<8x16xf32> to vector<8xf32>
    %27 = vector.shape_cast %26 : vector<8xf32> to vector<8x1xf32>
    %cst_6 = arith.constant 0.000000e+00 : f32
    %28 = vector.broadcast %cst_6 : f32 to vector<8x1xf32>
    %29 = arith.subf %28, %27 : vector<8x1xf32>
    %30 = arith.mulf %29, %7 : vector<8x1xf32>
    %31 = vector.shape_cast %30 : vector<8x1xf32> to vector<1x8x1xf32>
    %cst_7 = arith.constant dense<0.000000e+00> : vector<1xf32>
    %32 = vector.multi_reduction <add>, %31, %cst_7 [1, 2] : vector<1x8x1xf32> to vector<1xf32>
    %33 = vector.shape_cast %32 : vector<1xf32> to vector<1x1x1xf32>
    %34 = vector.extract %33[0, 0, 0] : f32 from vector<1x1x1xf32>
    %c0_8 = arith.constant 0 : index
    %c0_9 = arith.constant 0 : index
    %35 = vector.load %arg2[%c0_8, %c0_9] : memref<8x16xf32, #tpu.memory_space<vmem>>, vector<8x16xf32>
    %cst_10 = arith.constant dense<0xFF800000> : vector<8xf32>
    %36 = vector.multi_reduction <maximumf>, %35, %cst_10 [1] : vector<8x16xf32> to vector<8xf32>
    %37 = vector.shape_cast %36 : vector<8xf32> to vector<8x1xf32>
    %38 = vector.broadcast %37 : vector<8x1xf32> to vector<8x16xf32>
    %39 = arith.subf %35, %38 : vector<8x16xf32>
    %40 = math.exp %39 : vector<8x16xf32>
    %cst_11 = arith.constant dense<0.000000e+00> : vector<8xf32>
    %41 = vector.multi_reduction <add>, %40, %cst_11 [1] : vector<8x16xf32> to vector<8xf32>
    %42 = vector.shape_cast %41 : vector<8xf32> to vector<8x1xf32>
    %43 = math.log %42 : vector<8x1xf32>
    %44 = vector.broadcast %43 : vector<8x1xf32> to vector<8x16xf32>
    %45 = arith.subf %39, %44 : vector<8x16xf32>
    %46 = tpu.iota {dimensions = array<i32: 1>} : vector<8x16xi32>
    %47 = vector.broadcast %8 : vector<8x1xi32> to vector<8x16xi32>
    %48 = arith.cmpi eq, %46, %47 : vector<8x16xi32>
    %49 = arith.extui %48 : vector<8x16xi1> to vector<8x16xi32>
    %50 = arith.sitofp %49 : vector<8x16xi32> to vector<8x16xf32>
    %51 = arith.mulf %50, %45 : vector<8x16xf32>
    %cst_12 = arith.constant dense<0.000000e+00> : vector<8xf32>
    %52 = vector.multi_reduction <add>, %51, %cst_12 [1] : vector<8x16xf32> to vector<8xf32>
    %53 = vector.shape_cast %52 : vector<8xf32> to vector<8x1xf32>
    %cst_13 = arith.constant 0.000000e+00 : f32
    %54 = vector.broadcast %cst_13 : f32 to vector<8x1xf32>
    %55 = arith.subf %54, %53 : vector<8x1xf32>
    %56 = arith.mulf %55, %7 : vector<8x1xf32>
    %57 = vector.shape_cast %56 : vector<8x1xf32> to vector<1x8x1xf32>
    %cst_14 = arith.constant dense<0.000000e+00> : vector<1xf32>
    %58 = vector.multi_reduction <add>, %57, %cst_14 [1, 2] : vector<1x8x1xf32> to vector<1xf32>
    %59 = vector.shape_cast %58 : vector<1xf32> to vector<1x1x1xf32>
    %60 = vector.extract %59[0, 0, 0] : f32 from vector<1x1x1xf32>
    %c0_15 = arith.constant 0 : index
    %c0_16 = arith.constant 0 : index
    %61 = vector.load %arg4[%c0_15, %c0_16] : memref<8x32xf32, #tpu.memory_space<vmem>>, vector<8x32xf32>
    %62 = arith.mulf %61, %61 : vector<8x32xf32>
    %cst_17 = arith.constant dense<0.000000e+00> : vector<8xf32>
    %63 = vector.multi_reduction <add>, %62, %cst_17 [1] : vector<8x32xf32> to vector<8xf32>
    %64 = vector.shape_cast %63 : vector<8xf32> to vector<8x1xf32>
    %65 = math.sqrt %64 : vector<8x1xf32>
    %cst_18 = arith.constant 9.99999996E-13 : f32
    %66 = vector.broadcast %cst_18 : f32 to vector<8x1xf32>
    %67 = arith.maximumf %65, %66 : vector<8x1xf32>
    %68 = vector.broadcast %67 : vector<8x1xf32> to vector<8x32xf32>
    %69 = arith.divf %61, %68 : vector<8x32xf32>
    %c0_19 = arith.constant 0 : index
    %c0_20 = arith.constant 0 : index
    %70 = vector.load %arg5[%c0_19, %c0_20] : memref<8x32xf32, #tpu.memory_space<vmem>>, vector<8x32xf32>
    %71 = arith.mulf %70, %70 : vector<8x32xf32>
    %cst_21 = arith.constant dense<0.000000e+00> : vector<8xf32>
    %72 = vector.multi_reduction <add>, %71, %cst_21 [1] : vector<8x32xf32> to vector<8xf32>
    %73 = vector.shape_cast %72 : vector<8xf32> to vector<8x1xf32>
    %74 = math.sqrt %73 : vector<8x1xf32>
    %cst_22 = arith.constant 9.99999996E-13 : f32
    %75 = vector.broadcast %cst_22 : f32 to vector<8x1xf32>
    %76 = arith.maximumf %74, %75 : vector<8x1xf32>
    %77 = vector.broadcast %76 : vector<8x1xf32> to vector<8x32xf32>
    %78 = arith.divf %70, %77 : vector<8x32xf32>
    %79 = arith.mulf %69, %78 : vector<8x32xf32>
    %cst_23 = arith.constant dense<0.000000e+00> : vector<8xf32>
    %80 = vector.multi_reduction <add>, %79, %cst_23 [1] : vector<8x32xf32> to vector<8xf32>
    %81 = vector.shape_cast %80 : vector<8xf32> to vector<8x1xf32>
    %82 = arith.mulf %81, %7 : vector<8x1xf32>
    %83 = vector.shape_cast %82 : vector<8x1xf32> to vector<1x8x1xf32>
    %cst_24 = arith.constant dense<0.000000e+00> : vector<1xf32>
    %84 = vector.multi_reduction <add>, %83, %cst_24 [1, 2] : vector<1x8x1xf32> to vector<1xf32>
    %85 = vector.shape_cast %84 : vector<1xf32> to vector<1x1x1xf32>
    %86 = vector.extract %85[0, 0, 0] : f32 from vector<1x1x1xf32>
    %c0_25 = arith.constant 0 : index
    %c0_26 = arith.constant 0 : index
    %87 = vector.load %arg6[%c0_25, %c0_26] : memref<8x256xf32, #tpu.memory_space<vmem>>, vector<8x256xf32>
    %c0_27 = arith.constant 0 : index
    %c0_28 = arith.constant 0 : index
    %88 = vector.load %arg7[%c0_27, %c0_28] : memref<8x256xf32, #tpu.memory_space<vmem>>, vector<8x256xf32>
    %89 = vector.shape_cast %87 : vector<8x256xf32> to vector<1x8x256xf32>
    %cst_29 = arith.constant dense<0.000000e+00> : vector<1xf32>
    %90 = vector.multi_reduction <add>, %89, %cst_29 [1, 2] : vector<1x8x256xf32> to vector<1xf32>
    %91 = vector.shape_cast %90 : vector<1xf32> to vector<1x1x1xf32>
    %92 = vector.extract %91[0, 0, 0] : f32 from vector<1x1x1xf32>
    %93 = vector.shape_cast %88 : vector<8x256xf32> to vector<1x8x256xf32>
    %cst_30 = arith.constant dense<0.000000e+00> : vector<1xf32>
    %94 = vector.multi_reduction <add>, %93, %cst_30 [1, 2] : vector<1x8x256xf32> to vector<1xf32>
    %95 = vector.shape_cast %94 : vector<1xf32> to vector<1x1x1xf32>
    %96 = vector.extract %95[0, 0, 0] : f32 from vector<1x1x1xf32>
    %cst_31 = arith.constant 1.000000e+00 : f32
    %97 = vector.broadcast %cst_31 : f32 to vector<8x256xf32>
    %98 = arith.subf %97, %88 : vector<8x256xf32>
    %99 = arith.mulf %88, %98 : vector<8x256xf32>
    %100 = vector.shape_cast %99 : vector<8x256xf32> to vector<1x8x256xf32>
    %cst_32 = arith.constant dense<0.000000e+00> : vector<1xf32>
    %101 = vector.multi_reduction <add>, %100, %cst_32 [1, 2] : vector<1x8x256xf32> to vector<1xf32>
    %102 = vector.shape_cast %101 : vector<1xf32> to vector<1x1x1xf32>
    %103 = vector.extract %102[0, 0, 0] : f32 from vector<1x1x1xf32>
    %cst_33 = arith.constant 8.000000e-01 : f32
    %104 = vector.broadcast %cst_33 : f32 to vector<8x256xf32>
    %105 = arith.cmpf ogt, %88, %104 : vector<8x256xf32>
    %106 = arith.extui %105 : vector<8x256xi1> to vector<8x256xi32>
    %107 = arith.sitofp %106 : vector<8x256xi32> to vector<8x256xf32>
    %108 = vector.broadcast %7 : vector<8x1xf32> to vector<8x256xf32>
    %109 = arith.mulf %107, %108 : vector<8x256xf32>
    %110 = vector.shape_cast %109 : vector<8x256xf32> to vector<1x8x256xf32>
    %cst_34 = arith.constant dense<0.000000e+00> : vector<1xf32>
    %111 = vector.multi_reduction <add>, %110, %cst_34 [1, 2] : vector<1x8x256xf32> to vector<1xf32>
    %112 = vector.shape_cast %111 : vector<1xf32> to vector<1x1x1xf32>
    %113 = vector.extract %112[0, 0, 0] : f32 from vector<1x1x1xf32>
    %cst_35 = arith.constant 9.99999997E-7 : f32
    %114 = vector.broadcast %cst_35 : f32 to vector<8x256xf32>
    %115 = arith.addf %87, %114 : vector<8x256xf32>
    %116 = math.log %115 : vector<8x256xf32>
    %117 = arith.mulf %87, %116 : vector<8x256xf32>
    %cst_36 = arith.constant 1.000000e+00 : f32
    %118 = vector.broadcast %cst_36 : f32 to vector<8x256xf32>
    %119 = arith.subf %118, %87 : vector<8x256xf32>
    %cst_37 = arith.constant 1.000000e+00 : f32
    %120 = vector.broadcast %cst_37 : f32 to vector<8x256xf32>
    %121 = arith.subf %120, %87 : vector<8x256xf32>
    %cst_38 = arith.constant 9.99999997E-7 : f32
    %122 = vector.broadcast %cst_38 : f32 to vector<8x256xf32>
    %123 = arith.addf %121, %122 : vector<8x256xf32>
    %124 = math.log %123 : vector<8x256xf32>
    %125 = arith.mulf %119, %124 : vector<8x256xf32>
    %126 = arith.addf %117, %125 : vector<8x256xf32>
    %cst_39 = arith.constant 0.000000e+00 : f32
    %127 = vector.broadcast %cst_39 : f32 to vector<8x256xf32>
    %128 = arith.subf %127, %126 : vector<8x256xf32>
    %129 = vector.broadcast %7 : vector<8x1xf32> to vector<8x256xf32>
    %130 = arith.mulf %128, %129 : vector<8x256xf32>
    %131 = vector.shape_cast %130 : vector<8x256xf32> to vector<1x8x256xf32>
    %cst_40 = arith.constant dense<0.000000e+00> : vector<1xf32>
    %132 = vector.multi_reduction <add>, %131, %cst_40 [1, 2] : vector<1x8x256xf32> to vector<1xf32>
    %133 = vector.shape_cast %132 : vector<1xf32> to vector<1x1x1xf32>
    %134 = vector.extract %133[0, 0, 0] : f32 from vector<1x1x1xf32>
    %135 = tpu.iota {dimensions = array<i32: 1>} : vector<1x8x128xi32>
    %cst_41 = arith.constant 0.000000e+00 : f32
    %136 = vector.broadcast %cst_41 : f32 to vector<1x8x128xf32>
    %c0_i32 = arith.constant 0 : i32
    %137 = vector.broadcast %c0_i32 : i32 to vector<1x8x128xi32>
    %138 = arith.cmpi eq, %135, %137 : vector<1x8x128xi32>
    %cst_42 = arith.constant 0.000000e+00 : f32
    %139 = vector.broadcast %34 : f32 to vector<1x8x128xf32>
    %140 = vector.broadcast %cst_42 : f32 to vector<1x8x128xf32>
    %141 = arith.select %138, %139, %140 : vector<1x8x128xi1>, vector<1x8x128xf32>
    %142 = arith.addf %136, %141 : vector<1x8x128xf32>
    %c1_i32 = arith.constant 1 : i32
    %143 = vector.broadcast %c1_i32 : i32 to vector<1x8x128xi32>
    %144 = arith.cmpi eq, %135, %143 : vector<1x8x128xi32>
    %cst_43 = arith.constant 0.000000e+00 : f32
    %145 = vector.broadcast %60 : f32 to vector<1x8x128xf32>
    %146 = vector.broadcast %cst_43 : f32 to vector<1x8x128xf32>
    %147 = arith.select %144, %145, %146 : vector<1x8x128xi1>, vector<1x8x128xf32>
    %148 = arith.addf %142, %147 : vector<1x8x128xf32>
    %c2_i32 = arith.constant 2 : i32
    %149 = vector.broadcast %c2_i32 : i32 to vector<1x8x128xi32>
    %150 = arith.cmpi eq, %135, %149 : vector<1x8x128xi32>
    %cst_44 = arith.constant 0.000000e+00 : f32
    %151 = vector.broadcast %86 : f32 to vector<1x8x128xf32>
    %152 = vector.broadcast %cst_44 : f32 to vector<1x8x128xf32>
    %153 = arith.select %150, %151, %152 : vector<1x8x128xi1>, vector<1x8x128xf32>
    %154 = arith.addf %148, %153 : vector<1x8x128xf32>
    %c3_i32 = arith.constant 3 : i32
    %155 = vector.broadcast %c3_i32 : i32 to vector<1x8x128xi32>
    %156 = arith.cmpi eq, %135, %155 : vector<1x8x128xi32>
    %cst_45 = arith.constant 0.000000e+00 : f32
    %157 = vector.broadcast %92 : f32 to vector<1x8x128xf32>
    %158 = vector.broadcast %cst_45 : f32 to vector<1x8x128xf32>
    %159 = arith.select %156, %157, %158 : vector<1x8x128xi1>, vector<1x8x128xf32>
    %160 = arith.addf %154, %159 : vector<1x8x128xf32>
    %c4_i32 = arith.constant 4 : i32
    %161 = vector.broadcast %c4_i32 : i32 to vector<1x8x128xi32>
    %162 = arith.cmpi eq, %135, %161 : vector<1x8x128xi32>
    %cst_46 = arith.constant 0.000000e+00 : f32
    %163 = vector.broadcast %96 : f32 to vector<1x8x128xf32>
    %164 = vector.broadcast %cst_46 : f32 to vector<1x8x128xf32>
    %165 = arith.select %162, %163, %164 : vector<1x8x128xi1>, vector<1x8x128xf32>
    %166 = arith.addf %160, %165 : vector<1x8x128xf32>
    %c5_i32 = arith.constant 5 : i32
    %167 = vector.broadcast %c5_i32 : i32 to vector<1x8x128xi32>
    %168 = arith.cmpi eq, %135, %167 : vector<1x8x128xi32>
    %cst_47 = arith.constant 0.000000e+00 : f32
    %169 = vector.broadcast %103 : f32 to vector<1x8x128xf32>
    %170 = vector.broadcast %cst_47 : f32 to vector<1x8x128xf32>
    %171 = arith.select %168, %169, %170 : vector<1x8x128xi1>, vector<1x8x128xf32>
    %172 = arith.addf %166, %171 : vector<1x8x128xf32>
    %c6_i32 = arith.constant 6 : i32
    %173 = vector.broadcast %c6_i32 : i32 to vector<1x8x128xi32>
    %174 = arith.cmpi eq, %135, %173 : vector<1x8x128xi32>
    %cst_48 = arith.constant 0.000000e+00 : f32
    %175 = vector.broadcast %134 : f32 to vector<1x8x128xf32>
    %176 = vector.broadcast %cst_48 : f32 to vector<1x8x128xf32>
    %177 = arith.select %174, %175, %176 : vector<1x8x128xi1>, vector<1x8x128xf32>
    %178 = arith.addf %172, %177 : vector<1x8x128xf32>
    %c7_i32 = arith.constant 7 : i32
    %179 = vector.broadcast %c7_i32 : i32 to vector<1x8x128xi32>
    %180 = arith.cmpi eq, %135, %179 : vector<1x8x128xi32>
    %cst_49 = arith.constant 0.000000e+00 : f32
    %181 = vector.broadcast %113 : f32 to vector<1x8x128xf32>
    %182 = vector.broadcast %cst_49 : f32 to vector<1x8x128xf32>
    %183 = arith.select %180, %181, %182 : vector<1x8x128xi1>, vector<1x8x128xf32>
    %184 = arith.addf %178, %183 : vector<1x8x128xf32>
    %c0_50 = arith.constant 0 : index
    %c0_51 = arith.constant 0 : index
    %c0_52 = arith.constant 0 : index
    %185 = vector.load %arg8[%c0_50, %c0_51, %c0_52] : memref<1x8x128xf32, #tpu.memory_space<vmem>>, vector<1x8x128xf32>
    tpu.vector_store %arg8[%c0_50, %c0_51, %c0_52], %184 {strides = array<i32>} : memref<1x8x128xf32, #tpu.memory_space<vmem>>, vector<1x8x128xf32>,
    return
  }
  func.func @transform_0(%arg0: i32) -> (i32, i32) {
    %c0_i32 = arith.constant 0 : i32
    %c0_i32_0 = arith.constant 0 : i32
    return %arg0, %c0_i32 : i32, i32
  }
  func.func @transform_1(%arg0: i32) -> (i32, i32) {
    %c0_i32 = arith.constant 0 : i32
    %c0_i32_0 = arith.constant 0 : i32
    return %arg0, %c0_i32 : i32, i32
  }
  func.func @transform_2(%arg0: i32) -> (i32, i32) {
    %c0_i32 = arith.constant 0 : i32
    %c0_i32_0 = arith.constant 0 : i32
    return %arg0, %c0_i32 : i32, i32
  }
  func.func @transform_3(%arg0: i32) -> (i32, i32) {
    %c0_i32 = arith.constant 0 : i32
    %c0_i32_0 = arith.constant 0 : i32
    return %arg0, %c0_i32 : i32, i32
  }
  func.func @transform_4(%arg0: i32) -> (i32, i32) {
    %c0_i32 = arith.constant 0 : i32
    %c0_i32_0 = arith.constant 0 : i32
    return %arg0, %c0_i32 : i32, i32
  }
  func.func @transform_5(%arg0: i32) -> (i32, i32) {
    %c0_i32 = arith.constant 0 : i32
    %c0_i32_0 = arith.constant 0 : i32
    return %arg0, %c0_i32 : i32, i32
  }
  func.func @transform_6(%arg0: i32) -> (i32, i32) {
    %c0_i32 = arith.constant 0 : i32
    %c0_i32_0 = arith.constant 0 : i32
    return %arg0, %c0_i32 : i32, i32
  }
  func.func @transform_7(%arg0: i32) -> (i32, i32, i32) {
    %c0_i32 = arith.constant 0 : i32
    %c0_i32_0 = arith.constant 0 : i32
    %c0_i32_1 = arith.constant 0 : i32
    return %arg0, %c0_i32, %c0_i32_0 : i32, i32, i32
  }
}

</mosaic_0001>

<bundles_post_ra>
// kernel: tpu_custom_call.1
= control target key start
LH: loop header
LB: loop body
LE: loop exit
PB: predicated region body
PF: predicated region fallthrough
CT: control target
= control target key end

     0   :  { %12 = vsyncpa [#allocation3], 0  ;;  %s716_s0 = inlined_call_operand.vmem [shape: f32[8,16], index: 0, kind: input, shape index: {}]   ;;  %s717_s1 = inlined_call_operand.hbm [shape: f32[8,16], index: 1, kind: input, shape index: {}]   ;;  %s718_s2 = inlined_call_operand.vmem [shape: s32[8,1], index: 2, kind: input, shape index: {}]   ;;  %s719_s3 = inlined_call_operand.hbm [shape: f32[8,32], index: 3, kind: input, shape index: {}]   ;;  %s720_s4 = inlined_call_operand.hbm [shape: f32[8,32], index: 4, kind: input, shape index: {}]   ;;  %s721_s5 = inlined_call_operand.hbm [shape: f32[8,256], index: 5, kind: input, shape index: {}]   ;;  %s722_s6 = inlined_call_operand.hbm [shape: f32[8,256], index: 6, kind: input, shape index: {}]   ;;  %s723_s7 = inlined_call_operand.hbm [shape: f32[1,8,128], index: 7, kind: output, shape index: {}]  }
   0x1   :  { %13 = vsyncpa [#allocation6], 0 }
   0x2   :  { %14 = vsyncpa [#allocation9], 0  ;;  %s36_s26 = sshll.u32 %s719_s3, 4  ;;  %s37_s26 = int_to_ptr.hbm [resolvable:$true] %s36_s26 }
   0x3   :  { %15 = vsyncpa [#allocation4], 0  ;;  %s600_s27 = smov [#allocation5]   ;;  %s58_s8 = sshll.u32 %s721_s5, 4  ;;  %s59_s8 = int_to_ptr.hbm [resolvable:$true] %s58_s8 }
   0x4   :  { %s38_s28 = sshll.u32 %s600_s27, 4  ;;  %s601_s9 = smov [#allocation8]   ;;  %s39_s28 = int_to_ptr.vmem [resolvable:$true] %s38_s28 }
   0x5   :  { %41 = dma.hbm_to_vmem [thread:$0]  %s37_s26, 128, %s39_s28, [#allocation6]  }
   0x6   :  { %s60_s10 = sshll.u32 %s601_s9, 4  ;;  %s23_s13 = sshll.u32 %s717_s1, 4  ;;  %s61_s10 = int_to_ptr.vmem [resolvable:$true] %s60_s10  ;;  %s24_s13 = int_to_ptr.hbm [resolvable:$true] %s23_s13 }
   0x7   :  { %63 = dma.hbm_to_vmem [thread:$0]  %s59_s8, 256, %s61_s10, [#allocation9]  }
   0x8   :  { %s47_s15 = sshll.u32 %s720_s4, 4  ;;  %s602_s16 = smov [#allocation2]   ;;  %s48_s15 = int_to_ptr.hbm [resolvable:$true] %s47_s15 }
   0x9   :  { %s25_s17 = sshll.u32 %s602_s16, 4  ;;  %s603_s5 = smov [#allocation7]   ;;  %s26_s17 = int_to_ptr.vmem [resolvable:$true] %s25_s17 }
   0xa   :  { %28 = dma.hbm_to_vmem [thread:$0]  %s24_s13, 128, %s26_s17, [#allocation3]  }
   0xb   :  { %s49_s18 = sshll.u32 %s603_s5, 4  ;;  %s69_s21 = sshll.u32 %s722_s6, 4  ;;  %s50_s18 = int_to_ptr.vmem [resolvable:$true] %s49_s18  ;;  %s70_s21 = int_to_ptr.hbm [resolvable:$true] %s69_s21 }
   0xc   :  { %52 = dma.hbm_to_vmem [thread:$0]  %s48_s15, 128, %s50_s18, [#allocation6]  }
   0xd   :  { %s604_s1 = smov [#allocation10]  }
   0xe   :  { %s71_s22 = sshll.u32 %s604_s1, 4  ;;  %s72_s22 = int_to_ptr.vmem [resolvable:$true] %s71_s22 }
   0xf   :  { %74 = dma.hbm_to_vmem [thread:$0]  %s70_s21, 256, %s72_s22, [#allocation9]  }
  0x10   :  { %592 = dma.done.wait [#allocation3], 128  }
  0x11   :  { %593 = vsyncadd [#allocation3], 4294967168 }
  0x12   :  { %594 = dma.done.wait [#allocation6], 256  }
  0x13   :  { %595 = vsyncadd [#allocation6], 4294967040 }
  0x14   :  { %596 = dma.done.wait [#allocation9], 512  }
  0x15   :  { %597 = vsyncadd [#allocation9], 4294966784  ;;  %vm105_vm0 = vcmask 130048   ;;  %v104_v0 = vld [vmem:[%s716_s0] sm:$0xff]  ;;  %v666_v1 = vld [vmem:[#allocation5] sm:$0xff]  ;;  %vm174_vm1 = vcmask 261120   ;;  %v96_v52 = vlaneseq }
  0x16   :  { %v106_v2 = vsel %vm105_vm0, %v104_v0, -inf  ;;  %v173_v3 = vmul.f32 %v666_v1, %v666_v1  ;;  %v671_v4 = vld [vmem:[#allocation7] sm:$0xff]  ;;  %v143_v6 = vld [vmem:[#allocation2] sm:$0xff]  ;;  %v605_v11 = vmov 0   ;;  %vm132_vm15 = vcmask 7168   ;;  %s607_s8 = smov [#allocation11]  }
  0x17   :  { %107 = vmax.xlane.f32.xlu0 %v106_v2  ;;  %v207_v7 = vmul.f32 %v671_v4, %v671_v4  ;;  %v144_v8 = vsel %vm105_vm0, %v143_v6, -inf  ;;  %v103_v10 = vld [vmem:[%s718_s2] sm:$0xff]  ;;  %v119_v56 = vand.u32 127, %v96_v52  ;;  %s382_s9 = sshll.u32 %s607_s8, 4  ;;  %s384_s12 = sshll.u32 %s723_s7, 4  ;;  %s383_s9 = int_to_ptr.vmem [resolvable:$true] %s382_s9  ;;  %s385_s12 = int_to_ptr.hbm [resolvable:$true] %s384_s12 }
  0x18   :  { %v175_v5 = vsel %vm174_vm1, %v173_v3, 0.0  ;;  %423 = vset.pattern.permute.xlu0 %v605_v11  ;;  %v606_v11 = vmov 0.0  }
  0x19   :  { %176 = vadd.xlane.f32.xlu1 %v175_v5  ;;  %v208_v9 = vsel %vm174_vm1, %v207_v7, 0.0 }
  0x1f   :  { %145 = vmax.xlane.f32.xlu0 %v144_v8 }
  0x21   :  { %209 = vadd.xlane.f32.xlu1 %v208_v9 }
  0x33   :  { %121 = vperm.xlu0 %423, %v103_v10  }
  0x8a   :  { %v108_v12 = vpop.xlane.xlu0 %107 }
  0x8b   :  { %v681_v13 = vsub.f32 %v104_v0, %v108_v12 }
  0x8c   :  { %v177_v22 = vpop.xlane.xlu1 %176 }
  0x8d   :  { %v110_v14 = vmul.f32 1.442695, %v681_v13  ;;  %vm185_vm2 = vcmp.eq.f32.partialorder %v177_v22, inf  ;;  %v188_v38 = vand.u32 2147483648, %v177_v22  ;;  %vm187_vm4 = vcmp.eq.f32.partialorder %v177_v22, 0.0 }
  0x8f   :  { %424 = vpow2.f32 %v110_v14 }
  0x92   :  { %v146_v15 = vpop.xlane.xlu0 %145 }
  0x93   :  { %v684_v16 = vsub.f32 %v143_v6, %v146_v15 }
  0x94   :  { %v210_v23 = vpop.xlane.xlu1 %209 }
  0x95   :  { %v425_v17 = vpop.eup %424  ;;  %v148_v18 = vmul.f32 1.442695, %v684_v16  ;;  %vm218_vm3 = vcmp.eq.f32.partialorder %v210_v23, inf  ;;  %v221_v40 = vand.u32 2147483648, %v210_v23  ;;  %vm220_vm5 = vcmp.eq.f32.partialorder %v210_v23, 0.0 }
  0x96   :  { %v112_v19 = vsel %vm105_vm0, %v425_v17, 0.0 }
  0x97   :  { %426 = vpow2.f32 %v148_v18  ;;  %113 = vadd.xlane.f32.xlu2 %v112_v19 }
  0x98   :  { %428 = vrsqrt.f32 %v177_v22 }
  0x99   :  { %430 = vrsqrt.f32 %v210_v23 }
  0x9d   :  { %v427_v20 = vpop.eup %426 }
  0x9e   :  { %v150_v21 = vsel %vm105_vm0, %v427_v20, 0.0  ;;  %v429_v24 = vpop.eup %428 }
  0x9f   :  { %151 = vadd.xlane.f32.xlu2 %v150_v21  ;;  %v431_v25 = vpop.eup %430  ;;  %v179_v26 = vmul.f32 %v429_v24, %v177_v22 }
  0xa0   :  { %v212_v27 = vmul.f32 %v431_v25, %v210_v23 }
  0xa1   :  { %v180_v28 = vmul.f32 %v429_v24, %v179_v26 }
  0xa2   :  { %v213_v29 = vmul.f32 %v431_v25, %v212_v27 }
  0xa3   :  { %v181_v30 = vmul.f32 0.5, %v180_v28  ;;  %v254_v28 = vld [vmem:[#allocation8] sm:$0xff] }
  0xa4   :  { %v214_v31 = vmul.f32 0.5, %v213_v29  ;;  %v255_v29 = vld [vmem:[#allocation8 + $0x8] sm:$0xff] }
  0xa5   :  { %v182_v32 = vsub.f32 1.5, %v181_v30  ;;  %v122_v57 = vpop.permute.xlu0 %121  ;;  %v258_v30 = vadd.f32 %v255_v29, %v254_v28 }
  0xa6   :  { %v215_v33 = vsub.f32 1.5, %v214_v31  ;;  %vm123_vm12 = vcmp.eq.s32.totalorder %v119_v56, %v122_v57  ;;  %v318_v31 = vsub.f32 1.0, %v254_v28 }
  0xa7   :  { %v183_v34 = vmul.f32 %v429_v24, %v182_v32  ;;  %v396_v12 = vsel %vm123_vm12, 1.0, %v606_v11  ;;  %v311_v32 = vadd.f32 1e-06, %v255_v29 }
  0xa8   :  { %v216_v35 = vmul.f32 %v431_v25, %v215_v33  ;;  %v320_v33 = vadd.f32 1e-06, %v318_v31 }
  0xa9   :  { %v184_v36 = vmul.f32 %v183_v34, %v177_v22 }
  0xaa   :  { %v217_v37 = vmul.f32 %v216_v35, %v210_v23 }
  0xab   :  { %v186_v39 = vsel %vm185_vm2, %v177_v22, %v184_v36 }
  0xac   :  { %v219_v41 = vsel %vm218_vm3, %v210_v23, %v217_v37  ;;  %v189_v42 = vsel %vm187_vm4, %v188_v38, %v186_v39 }
  0xad   :  { %v222_v43 = vsel %vm220_vm5, %v221_v40, %v219_v41  ;;  %v190_v44 = vmax.f32 %v189_v42, 1e-12 }
  0xae   :  { %v223_v45 = vmax.f32 %v222_v43, 1e-12 }
  0xaf   :  { %432 = vrcp.f32 %v190_v44  ;;  %vm196_vm6 = vweird.f32 %v190_v44  ;;  %v202_v59 = vand.u32 2147483648, %v190_v44  ;;  %v200_v62 = vand.u32 2147483647, %v190_v44 }
  0xb0   :  { %434 = vrcp.f32 %v223_v45  ;;  %vm229_vm8 = vweird.f32 %v223_v45  ;;  %v235_v60 = vand.u32 2147483648, %v223_v45  ;;  %v233_v0 = vand.u32 2147483647, %v223_v45 }
  0xb1   :  { %v203_v6 = vor.u32 1.1754944e-38, %v202_v59  ;;  %vm201_vm13 = vcmp.eq.f32.partialorder %v200_v62, 8.507059e+37 }
  0xb2   :  { %v236_v7 = vor.u32 1.1754944e-38, %v235_v60  ;;  %vm234_vm14 = vcmp.eq.f32.partialorder %v233_v0, 8.507059e+37 }
  0xb5   :  { %v433_v46 = vpop.eup %432 }
  0xb6   :  { %v435_v47 = vpop.eup %434  ;;  %v192_v48 = vmul.f32 %v433_v46, %v190_v44  ;;  %vm197_vm7 = vweird.f32 %v433_v46 }
  0xb7   :  { %v225_v49 = vmul.f32 %v435_v47, %v223_v45  ;;  %vm230_vm9 = vweird.f32 %v435_v47  ;;  %vm690_vm10 = vmor %vm196_vm6, %vm197_vm7 }
  0xb8   :  { %v193_v50 = vsub.f32 1.0, %v192_v48  ;;  %vm694_vm11 = vmor %vm229_vm8, %vm230_vm9 }
  0xb9   :  { %v226_v51 = vsub.f32 1.0, %v225_v49 }
  0xba   :  { %v194_v53 = vmul.f32 %v433_v46, %v193_v50 }
  0xbb   :  { %v227_v55 = vmul.f32 %v435_v47, %v226_v51 }
  0xbc   :  { %v195_v58 = vadd.f32 %v433_v46, %v194_v53  ;;  %v256_v53 = vld [vmem:[#allocation10] sm:$0xff] }
  0xbd   :  { %v228_v63 = vadd.f32 %v435_v47, %v227_v55  ;;  %v278_v57 = vsub.f32 1.0, %v256_v53 }
  0xbe   :  { %v199_v5 = vsel %vm690_vm10, %v433_v46, %v195_v58 }
  0xbf   :  { %v232_v10 = vsel %vm694_vm11, %v435_v47, %v228_v63  ;;  %v204_v15 = vsel %vm201_vm13, %v203_v6, %v199_v5  ;;  %v280_v62 = vmul.f32 %v278_v57, %v256_v53 }
  0xc0   :  { %v237_v17 = vsel %vm234_vm14, %v236_v7, %v232_v10  ;;  %v205_v20 = vmul.f32 %v204_v15, %v666_v1  ;;  %v310_v1 = vadd.f32 1e-06, %v254_v28 }
  0xc1   :  { %v238_v21 = vmul.f32 %v237_v17, %v671_v4  ;;  %v319_v4 = vsub.f32 1.0, %v255_v29 }
  0xc3   :  { %v239_v25 = vmul.f32 %v238_v21, %v205_v20  ;;  %v321_v34 = vadd.f32 1e-06, %v319_v4 }
 0x10a   :  { %v114_v54 = vpop.xlane.xlu2 %113 }
 0x10b   :  { %436 = vlog2.f32 %v114_v54  ;;  %v257_v54 = vld [vmem:[#allocation10 + $0x8] sm:$0xff] }
 0x10c   :  { %v279_v58 = vsub.f32 1.0, %v257_v54  ;;  %v268_v5 = vadd.f32 %v257_v54, %v256_v53 }
 0x10e   :  { %v281_v63 = vmul.f32 %v279_v58, %v257_v54 }
 0x110   :  { %v282_v2 = vadd.f32 %v281_v63, %v280_v62 }
 0x111   :  { %v437_v3 = vpop.eup %436 }
 0x112   :  { %v116_v8 = vmul.f32 0.6931472, %v437_v3  ;;  %v152_v9 = vpop.xlane.xlu2 %151 }
 0x113   :  { %438 = vlog2.f32 %v152_v9 }
 0x114   :  { %v117_v14 = vsub.f32 %v681_v13, %v116_v8  ;;  %v240_v13 = vsel %vm174_vm1, %v239_v25, 0.0  ;;  %440 = vlog2.f32 %v310_v1  ;;  %vm293_vm1 = vcmp.gt.f32.partialorder %v257_v54, 0.8 }
 0x115   :  { %442 = vlog2.f32 %v311_v32  ;;  %v398_v7 = vsel %vm293_vm1, 1.0, %v606_v11 }
 0x116   :  { %v126_v18 = vmul.f32 %v396_v12, %v117_v14  ;;  %444 = vlog2.f32 %v320_v33 }
 0x117   :  { %446 = vlog2.f32 %v321_v34 }
 0x118   :  { %v127_v19 = vsel %vm105_vm0, %v126_v18, 0.0 }
 0x119   :  { %v439_v22 = vpop.eup %438  ;;  %128 = vadd.xlane.f32.xlu1 %v127_v19 }
 0x11a   :  { %v154_v23 = vmul.f32 0.6931472, %v439_v22 }
 0x11c   :  { %v155_v24 = vsub.f32 %v684_v16, %v154_v23  ;;  %v441_v16 = vpop.eup %440 }
 0x11d   :  { %v443_v35 = vpop.eup %442  ;;  %v313_v36 = vmul.f32 0.6931472, %v441_v16 }
 0x11e   :  { %v156_v26 = vmul.f32 %v396_v12, %v155_v24  ;;  %v445_v37 = vpop.eup %444  ;;  %v315_v38 = vmul.f32 0.6931472, %v443_v35 }
 0x11f   :  { %v447_v39 = vpop.eup %446  ;;  %v316_v40 = vmul.f32 %v313_v36, %v254_v28  ;;  %v323_v41 = vmul.f32 0.6931472, %v445_v37 }
 0x120   :  { %v157_v27 = vsel %vm105_vm0, %v156_v26, 0.0  ;;  %v317_v42 = vmul.f32 %v315_v38, %v255_v29  ;;  %v325_v43 = vmul.f32 0.6931472, %v447_v39  ;;  %vm292_vm0 = vcmp.gt.f32.partialorder %v256_v53, 0.8 }
 0x121   :  { %158 = vadd.xlane.f32.xlu2 %v157_v27  ;;  %241 = vadd.xlane.f32.xlu1 %v240_v13  ;;  %v326_v44 = vmul.f32 %v323_v41, %v318_v31  ;;  %v397_v6 = vsel %vm292_vm0, 1.0, %v606_v11 }
 0x122   :  { %v327_v45 = vmul.f32 %v325_v43, %v319_v4  ;;  %v300_v8 = vadd.f32 %v398_v7, %v397_v6 }
 0x123   :  { %v328_v46 = vadd.f32 %v326_v44, %v316_v40 }
 0x124   :  { %v329_v47 = vadd.f32 %v327_v45, %v317_v42 }
 0x125   :  { %v330_v48 = vsub.f32 0.0, %v328_v46 }
 0x126   :  { %v331_v49 = vsub.f32 0.0, %v329_v47 }
 0x128   :  { %v334_v50 = vadd.f32 %v331_v49, %v330_v48 }
 0x129   :  { %259 = vadd.xlane.f32.xlu1 %v258_v30 }
 0x12a   :  { %335 = vadd.xlane.f32.xlu0 %v334_v50 }
 0x18c   :  { %v129_v51 = vpop.xlane.xlu1 %128 }
 0x18d   :  { %v130_v0 = vsub.f32 0.0, %v129_v51 }
 0x18f   :  { %v133_v3 = vsel %vm132_vm15, %v130_v0, 0.0  ;;  %v97_v0 = vshrl.u32 %v96_v52, 7 }
 0x191   :  { %vm344_vm2 = vcmp.eq.s32.totalorder %v97_v0, 0  ;;  %vm348_vm3 = vcmp.eq.s32.totalorder %v97_v0, 1  ;;  %vm352_vm4 = vcmp.eq.s32.totalorder %v97_v0, 2  ;;  %vm356_vm5 = vcmp.eq.s32.totalorder %v97_v0, 3 }
 0x192   :  { %vm360_vm6 = vcmp.eq.s32.totalorder %v97_v0, 4  ;;  %vm364_vm7 = vcmp.eq.s32.totalorder %v97_v0, 5  ;;  %vm368_vm8 = vcmp.eq.s32.totalorder %v97_v0, 6  ;;  %vm372_vm9 = vcmp.eq.s32.totalorder %v97_v0, 7 }
 0x194   :  { %v159_v55 = vpop.xlane.xlu2 %158  ;;  %v242_v56 = vpop.xlane.xlu1 %241 }
 0x195   :  { %v160_v59 = vsub.f32 0.0, %v159_v55  ;;  %v244_v60 = vsel %vm132_vm15, %v242_v56, 0.0 }
 0x196   :  { %245 = vadd.xlane.f32.xlu2 %v244_v60 }
 0x197   :  { %v162_v61 = vsel %vm132_vm15, %v160_v59, 0.0 }
 0x198   :  { %163 = vadd.xlane.f32.xlu1 %v162_v61 }
 0x19c   :  { %v260_v9 = vpop.xlane.xlu1 %259 }
 0x19d   :  { %v261_v14 = vrot.slane %v260_v9, 4  ;;  %v336_v30 = vpop.xlane.xlu0 %335 }
 0x19e   :  { %134 = vadd.xlane.f32.xlu2 %v133_v3  ;;  %v337_v34 = vrot.slane %v336_v30, 4 }
 0x19f   :  { %v262_v20 = vadd.f32 %v261_v14, %v260_v9 }
 0x1a0   :  { %283 = vadd.xlane.f32.xlu1 %v282_v2  ;;  %v338_v42 = vadd.f32 %v337_v34, %v336_v30 }
 0x1a1   :  { %v263_v25 = vrot.slane %v262_v20, 2 }
 0x1a2   :  { %v339_v49 = vrot.slane %v338_v42, 2 }
 0x1a3   :  { %v264_v31 = vadd.f32 %v263_v25, %v262_v20 }
 0x1a4   :  { %v340_v57 = vadd.f32 %v339_v49, %v338_v42 }
 0x1a5   :  { %v265_v39 = vrot.slane %v264_v31, 1 }
 0x1a6   :  { %269 = vadd.xlane.f32.xlu2 %v268_v5  ;;  %v341_v60 = vrot.slane %v340_v57, 1 }
 0x1a7   :  { %v266_v46 = vadd.f32 %v265_v39, %v264_v31 }
 0x1a8   :  { %v342_v63 = vadd.f32 %v341_v60, %v340_v57 }
 0x1ae   :  { %301 = vadd.xlane.f32.xlu2 %v300_v8 }
 0x209   :  { %v246_v10 = vpop.xlane.xlu2 %245 }
 0x20a   :  { %v247_v12 = vrot.slane %v246_v10, 4 }
 0x20b   :  { %v164_v15 = vpop.xlane.xlu1 %163 }
 0x20c   :  { %v165_v17 = vrot.slane %v164_v15, 4  ;;  %v248_v18 = vadd.f32 %v247_v12, %v246_v10 }
 0x20e   :  { %v166_v19 = vadd.f32 %v165_v17, %v164_v15  ;;  %v249_v23 = vrot.slane %v248_v18, 2 }
 0x210   :  { %v167_v21 = vrot.slane %v166_v19, 2  ;;  %v250_v1 = vadd.f32 %v249_v23, %v248_v18 }
 0x211   :  { %v135_v22 = vpop.xlane.xlu2 %134 }
 0x212   :  { %v136_v24 = vrot.slane %v135_v22, 4  ;;  %v168_v11 = vadd.f32 %v167_v21, %v166_v19  ;;  %v251_v37 = vrot.slane %v250_v1, 1 }
 0x213   :  { %v284_v26 = vpop.xlane.xlu1 %283 }
 0x214   :  { %v137_v27 = vadd.f32 %v136_v24, %v135_v22  ;;  %v285_v13 = vrot.slane %v284_v26, 4  ;;  %v169_v16 = vrot.slane %v168_v11, 1  ;;  %v252_v45 = vadd.f32 %v251_v37, %v250_v1 }
 0x216   :  { %v138_v28 = vrot.slane %v137_v27, 2  ;;  %v286_v29 = vadd.f32 %v285_v13, %v284_v26  ;;  %v170_v43 = vadd.f32 %v169_v16, %v168_v11 }
 0x218   :  { %v287_v4 = vrot.slane %v286_v29, 2  ;;  %v139_v32 = vadd.f32 %v138_v28, %v137_v27 }
 0x219   :  { %v270_v33 = vpop.xlane.xlu2 %269 }
 0x21a   :  { %v271_v35 = vrot.slane %v270_v33, 4  ;;  %v140_v36 = vrot.slane %v139_v32, 1  ;;  %v288_v38 = vadd.f32 %v287_v4, %v286_v29 }
 0x21c   :  { %v272_v40 = vadd.f32 %v271_v35, %v270_v33  ;;  %v141_v41 = vadd.f32 %v140_v36, %v139_v32  ;;  %v289_v47 = vrot.slane %v288_v38, 1 }
 0x21e   :  { %v273_v44 = vrot.slane %v272_v40, 2  ;;  %399 = vpush %v141_v41  ;;  %v290_v54 = vadd.f32 %v289_v47, %v288_v38 }
 0x21f   :  { %401 = vpush %v170_v43 }
 0x220   :  { %403 = vpush %v252_v45  ;;  %v274_v48 = vadd.f32 %v273_v44, %v272_v40 }
 0x221   :  { %405 = vpush %v266_v46  ;;  %v302_v50 = vpop.xlane.xlu2 %301 }
 0x222   :  { %v303_v51 = vrot.slane %v302_v50, 4  ;;  %v275_v53 = vrot.slane %v274_v48, 1 }
 0x224   :  { %v304_v55 = vadd.f32 %v303_v51, %v302_v50  ;;  %v276_v56 = vadd.f32 %v275_v53, %v274_v48 }
 0x226   :  { %v305_v58 = vrot.slane %v304_v55, 2  ;;  %407 = vpush %v276_v56 }
 0x227   :  { %409 = vpush %v290_v54 }
 0x228   :  { %v306_v59 = vadd.f32 %v305_v58, %v304_v55 }
 0x22a   :  { %v307_v61 = vrot.slane %v306_v59, 1 }
 0x22c   :  { %v308_v62 = vadd.f32 %v307_v61, %v306_v59 }
 0x22e   :  { %411 = vpush %v308_v62 }
 0x22f   :  { %413 = vpush %v342_v63 }
 0x24f   :  { %s400_s2 = spop %399 }
 0x250   :  { %v345_v2 = vstv %s400_s2  ;;  %s402_s24 = spop %401 }
 0x251   :  { %v346_v3 = vsel %vm344_vm2, %v345_v2, 0.0  ;;  %v349_v5 = vstv %s402_s24  ;;  %s404_s25 = spop %403 }
 0x252   :  { %v350_v6 = vsel %vm348_vm3, %v349_v5, 0.0  ;;  %v353_v8 = vstv %s404_s25  ;;  %s406_s26 = spop %405 }
 0x253   :  { %v351_v7 = vadd.f32 %v350_v6, %v346_v3  ;;  %v354_v9 = vsel %vm352_vm4, %v353_v8, 0.0  ;;  %v357_v12 = vstv %s406_s26 }
 0x254   :  { %v358_v14 = vsel %vm356_vm5, %v357_v12, 0.0 }
 0x255   :  { %v355_v10 = vadd.f32 %v354_v9, %v351_v7 }
 0x257   :  { %s408_s27 = spop %407  ;;  %v359_v17 = vadd.f32 %v358_v14, %v355_v10 }
 0x258   :  { %v361_v52 = vstv %s408_s27  ;;  %s410_s28 = spop %409 }
 0x259   :  { %v362_v15 = vsel %vm360_vm6, %v361_v52, 0.0  ;;  %v365_v19 = vstv %s410_s28 }
 0x25a   :  { %v363_v18 = vadd.f32 %v362_v15, %v359_v17  ;;  %v366_v20 = vsel %vm364_vm7, %v365_v19, 0.0 }
 0x25c   :  { %v367_v21 = vadd.f32 %v366_v20, %v363_v18 }
 0x25f   :  { %s412_s29 = spop %411 }
 0x260   :  { %s414_s30 = spop %413  ;;  %v373_v22 = vstv %s412_s29 }
 0x261   :  { %v369_v23 = vstv %s414_s30  ;;  %v374_v26 = vsel %vm372_vm9, %v373_v22, 0.0 }
 0x262   :  { %v370_v24 = vsel %vm368_vm8, %v369_v23, 0.0 }
 0x263   :  { %v371_v25 = vadd.f32 %v370_v24, %v367_v21 }
 0x265   :  { %v375_v27 = vadd.f32 %v374_v26, %v371_v25 }
 0x267   :  { %376 = vst [vmem:[#allocation11] sm:$0xff] %v375_v27 }
 0x268   :  { %387 = dma.vmem_to_hbm [thread:$0]  %s383_s9, 128, %s385_s12, [#allocation4]  }
 0x269   :  { %598 = dma.done.wait [#allocation4], 128  }
 0x26a   :  { %599 = vsyncadd [#allocation4], 4294967168 }
 0x26b   :  { %392 = vsyncpa [#allocation3], 1 }
 0x26c   :  { %393 = vsyncpa [#allocation6], 1 }
 0x26d   :  { %394 = vsyncpa [#allocation9], 1 }
 0x26e   :  { %395 = vsyncpa [#allocation4], 1 }

</bundles_post_ra>
